<compile_context>
chip_gen: v7x
topology: tpu7x:2x2x1
jax: 0.10.0
libtpu: 0.0.40
codegen_flags: <defaults>
</compile_context>

<pallas_src>
import jax
import jax.numpy as jnp
from jax.experimental import pallas as pl
from jax.experimental.pallas import tpu as pltpu

GAMMA = 2.0   # hard-coded: gamma == 2 -> square via multiply
ALPHA = 0.25

LANES = 512        # lane-dense last dim (multiple of 128)
TILE_ROWS = 512    # rows per grid step (sweepable 256-1024)


def focal_loss_kernel(x0_ref, x1_ref, t_ref, o_ref):
    # x0_ref/x1_ref: (tr, LANES) logits for class 0 / class 1
    # t_ref:         (tr, LANES) target in {0, 1} (any numeric dtype)
    # o_ref:         (tr, LANES) per-pixel focal loss
    x0 = x0_ref[...].astype(jnp.float32)
    x1 = x1_ref[...].astype(jnp.float32)
    t = t_ref[...].astype(jnp.float32)

    # 2-class softmax in log-space:  p = softmax[..,1] = sigmoid(x1 - x0)
    z = x1 - x0
    sp = jnp.log1p(jnp.exp(-jnp.abs(z)))      # softplus(-|z|), numerically stable
    log_p = jnp.minimum(z, 0.0) - sp          # log(p)     = -softplus(-z)
    log_1mp = jnp.minimum(-z, 0.0) - sp       # log(1 - p) = -softplus(z)
    p = jnp.exp(log_p)
    omp = jnp.exp(log_1mp)                    # 1 - p (accurate even when p -> 1)

    # gamma == 2 -> explicit multiplies (VALU) instead of pow (exp/log on EUP)
    loss = (-ALPHA * (omp * omp) * (t * log_p)
            - (1.0 - ALPHA) * (p * p) * ((1.0 - t) * log_1mp))

    o_ref[...] = loss.astype(o_ref.dtype)


def focal_loss(inp, target, *, out_dtype=jnp.float32):
    """inp: (N, 2, H, W) logits (f32/bf16); target: (N, H, W) in {0,1}."""
    N, C, H, W = inp.shape
    assert C == 2, "FocalLoss indexes channel 1 of a 2-class softmax"
    assert target.shape == (N, H, W)

    total = N * H * W

    # Split channels and flatten to a lane-dense 2D layout.
    x0 = inp[:, 0].reshape(total)
    x1 = inp[:, 1].reshape(total)
    t = target.reshape(total)

    rows = -(-total // LANES)
    if rows >= TILE_ROWS:
        tr = TILE_ROWS
        rows_padded = -(-rows // tr) * tr
    else:
        # small problem: single block, rounded up to a multiple of 8 sublanes
        rows_padded = -(-rows // 8) * 8
        tr = rows_padded

    padded_total = rows_padded * LANES
    pad = padded_total - total
    if pad:
        # zero-pad: z = 0 -> finite loss in the kernel; padding is sliced away
        x0 = jnp.pad(x0, (0, pad))
        x1 = jnp.pad(x1, (0, pad))
        t = jnp.pad(t, (0, pad))

    x0 = x0.reshape(rows_padded, LANES)
    x1 = x1.reshape(rows_padded, LANES)
    t = t.reshape(rows_padded, LANES)

    grid = (rows_padded // tr,)
    blk = pl.BlockSpec((tr, LANES), lambda i: (i, 0))

    out = pl.pallas_call(
        focal_loss_kernel,
        out_shape=jax.ShapeDtypeStruct((rows_padded, LANES), out_dtype),
        grid_spec=pltpu.PrefetchScalarGridSpec(
            num_scalar_prefetch=0,
            grid=grid,
            in_specs=[
                pl.BlockSpec((tr, LANES), lambda i: (i, 0)),  # x0
                pl.BlockSpec((tr, LANES), lambda i: (i, 0)),  # x1
                pl.BlockSpec((tr, LANES), lambda i: (i, 0)),  # target
            ],
            out_specs=blk,
        ),
        compiler_params=pltpu.CompilerParams(
            dimension_semantics=("parallel",),
            # ~8 MiB live with double buffering at (512, 512) f32 blocks;
            # 32 MiB is safe on v5e/v6e/v7x scoped-VMEM budgets.
            vmem_limit_bytes=32 * 1024 * 1024,
        ),
    )(x0, x1, t)

    return out.reshape(padded_total)[:total].reshape(N, H, W)


def focal_loss_ref(inp, target):
    # Straightforward softmax formulation (pure-JAX reference).
    pt = jax.nn.softmax(inp.astype(jnp.float32), axis=1)
    p = pt[:, 1]
    tgt = target.astype(jnp.float32)
    return (-ALPHA * (1.0 - p) ** GAMMA * (tgt * jnp.log(p))
            - (1.0 - ALPHA) * p ** GAMMA * ((1.0 - tgt) * jnp.log(1.0 - p)))


if __name__ == "__main__":
    key = jax.random.PRNGKey(0)
    k1, k2 = jax.random.split(key)

    N, C, H, W = 2, 2, 16, 16
    logits = jax.random.normal(k1, (N, C, H, W), dtype=jnp.float32)
    target = (jax.random.uniform(k2, (N, H, W)) > 0.5).astype(jnp.float32)

    out = focal_loss(logits, target)
    jax.block_until_ready(out)

    ref = focal_loss_ref(logits, target)
    assert out.shape == (N, H, W)
    assert jnp.allclose(out, ref, atol=1e-5, rtol=1e-5)

    # TODO(synk): PyTorch forward returns None (missing `return`); we return the
    # per-element NHW loss it computes.  If callers only need a mean/sum, a
    # scalar-accumulator variant would drop the output writeback entirely.

    print("KERNEL_OK")
</pallas_src>

<mosaic_0001>
module attributes {stable_mosaic.version = 11 : i64} {
  func.func @focal_loss_kernel(%arg0: i32, %arg1: memref<8x512xf32, #tpu.memory_space<vmem>>, %arg2: memref<8x512xf32, #tpu.memory_space<vmem>>, %arg3: memref<8x512xf32, #tpu.memory_space<vmem>>, %arg4: memref<8x512xf32, #tpu.memory_space<vmem>>) attributes {dimension_semantics = [#tpu.dimension_semantics<parallel>], iteration_bounds = array<i64: 1>, scalar_prefetch = 0 : i64, scratch_operands = 0 : i64, tpu.core_type = #tpu.core_type<tc>, window_params = [{transform_indices = @transform_0, window_bounds = array<i64: 8, 512>}, {transform_indices = @transform_1, window_bounds = array<i64: 8, 512>}, {transform_indices = @transform_2, window_bounds = array<i64: 8, 512>}, {transform_indices = @transform_3, window_bounds = array<i64: 8, 512>}]} {
    %c0 = arith.constant 0 : index
    %c0_0 = arith.constant 0 : index
    %0 = vector.load %arg1[%c0, %c0_0] : memref<8x512xf32, #tpu.memory_space<vmem>>, vector<8x512xf32>
    %c0_1 = arith.constant 0 : index
    %c0_2 = arith.constant 0 : index
    %1 = vector.load %arg2[%c0_1, %c0_2] : memref<8x512xf32, #tpu.memory_space<vmem>>, vector<8x512xf32>
    %c0_3 = arith.constant 0 : index
    %c0_4 = arith.constant 0 : index
    %2 = vector.load %arg3[%c0_3, %c0_4] : memref<8x512xf32, #tpu.memory_space<vmem>>, vector<8x512xf32>
    %3 = arith.subf %1, %0 : vector<8x512xf32>
    %4 = math.absf %3 : vector<8x512xf32>
    %cst = arith.constant 0.000000e+00 : f32
    %5 = vector.broadcast %cst : f32 to vector<8x512xf32>
    %6 = arith.subf %5, %4 : vector<8x512xf32>
    %7 = math.exp %6 : vector<8x512xf32>
    %8 = math.log1p %7 : vector<8x512xf32>
    %cst_5 = arith.constant 0.000000e+00 : f32
    %9 = vector.broadcast %cst_5 : f32 to vector<8x512xf32>
    %10 = arith.minimumf %3, %9 : vector<8x512xf32>
    %11 = arith.subf %10, %8 : vector<8x512xf32>
    %cst_6 = arith.constant 0.000000e+00 : f32
    %12 = vector.broadcast %cst_6 : f32 to vector<8x512xf32>
    %13 = arith.subf %12, %3 : vector<8x512xf32>
    %cst_7 = arith.constant 0.000000e+00 : f32
    %14 = vector.broadcast %cst_7 : f32 to vector<8x512xf32>
    %15 = arith.minimumf %13, %14 : vector<8x512xf32>
    %16 = arith.subf %15, %8 : vector<8x512xf32>
    %17 = math.exp %11 : vector<8x512xf32>
    %18 = math.exp %16 : vector<8x512xf32>
    %19 = arith.mulf %18, %18 : vector<8x512xf32>
    %cst_8 = arith.constant -2.500000e-01 : f32
    %20 = vector.broadcast %cst_8 : f32 to vector<8x512xf32>
    %21 = arith.mulf %20, %19 : vector<8x512xf32>
    %22 = arith.mulf %2, %11 : vector<8x512xf32>
    %23 = arith.mulf %21, %22 : vector<8x512xf32>
    %24 = arith.mulf %17, %17 : vector<8x512xf32>
    %cst_9 = arith.constant 7.500000e-01 : f32
    %25 = vector.broadcast %cst_9 : f32 to vector<8x512xf32>
    %26 = arith.mulf %25, %24 : vector<8x512xf32>
    %cst_10 = arith.constant 1.000000e+00 : f32
    %27 = vector.broadcast %cst_10 : f32 to vector<8x512xf32>
    %28 = arith.subf %27, %2 : vector<8x512xf32>
    %29 = arith.mulf %28, %16 : vector<8x512xf32>
    %30 = arith.mulf %26, %29 : vector<8x512xf32>
    %31 = arith.subf %23, %30 : vector<8x512xf32>
    %c0_11 = arith.constant 0 : index
    %c0_12 = arith.constant 0 : index
    %32 = vector.load %arg4[%c0_11, %c0_12] : memref<8x512xf32, #tpu.memory_space<vmem>>, vector<8x512xf32>
    tpu.vector_store %arg4[%c0_11, %c0_12], %31 {strides = array<i32>} : memref<8x512xf32, #tpu.memory_space<vmem>>, vector<8x512xf32>,
    return
  }
  func.func @transform_0(%arg0: i32) -> (i32, i32) {
    %c0_i32 = arith.constant 0 : i32
    %c0_i32_0 = arith.constant 0 : i32
    return %arg0, %c0_i32 : i32, i32
  }
  func.func @transform_1(%arg0: i32) -> (i32, i32) {
    %c0_i32 = arith.constant 0 : i32
    %c0_i32_0 = arith.constant 0 : i32
    return %arg0, %c0_i32 : i32, i32
  }
  func.func @transform_2(%arg0: i32) -> (i32, i32) {
    %c0_i32 = arith.constant 0 : i32
    %c0_i32_0 = arith.constant 0 : i32
    return %arg0, %c0_i32 : i32, i32
  }
  func.func @transform_3(%arg0: i32) -> (i32, i32) {
    %c0_i32 = arith.constant 0 : i32
    %c0_i32_0 = arith.constant 0 : i32
    return %arg0, %c0_i32 : i32, i32
  }
}

</mosaic_0001>

<bundles_post_ra>
// kernel: tpu_custom_call.1
= control target key start
LH: loop header
LB: loop body
LE: loop exit
PB: predicated region body
PF: predicated region fallthrough
CT: control target
= control target key end

     0   :  { %8 = vsyncpa [#allocation3], 0  ;;  %s436_s0 = inlined_call_operand.hbm [shape: f32[8,512], index: 0, kind: input, shape index: {}]   ;;  %s437_s1 = inlined_call_operand.hbm [shape: f32[8,512], index: 1, kind: input, shape index: {}]   ;;  %s438_s2 = inlined_call_operand.hbm [shape: f32[8,512], index: 2, kind: input, shape index: {}]   ;;  %s439_s3 = inlined_call_operand.hbm [shape: f32[8,512], index: 3, kind: output, shape index: {}]  }
   0x1   :  { %9 = vsyncpa [#allocation6], 0 }
   0x2   :  { %10 = vsyncpa [#allocation4], 0  ;;  %s344_s12 = smov [#allocation5]   ;;  %s345_s14 = smov [#allocation2]  }
   0x3   :  { %s27_s13 = sshll.u32 %s344_s12, 4  ;;  %s17_s15 = sshll.u32 %s345_s14, 4  ;;  %s28_s13 = int_to_ptr.vmem [resolvable:$true] %s27_s13  ;;  %s18_s15 = int_to_ptr.vmem [resolvable:$true] %s17_s15 }
   0x4   :  { %s250_s18 = scalar_lea.hbm %s437_s1, 512 }
   0x5   :  { %p251_p0 = scmp.ne.s32.totalorder %s437_s1, %s250_s18  ;;  %p254_p1 = scmp.lt.u32.totalorder %s250_s18, %s437_s1 }
   0x7   :  { %p256_p2 = pnand %p254_p1, %p251_p0 }
   0x9   :  { %259 = shalt.err (!%p256_p2)
}
   0xa   :  { %s260_s23 = scalar_lea.vmem %s28_s13, 512  ;;  %p265_p4 = scmp.lt.s32.totalorder %s28_s13, %s28_s13 }
   0xb   :  { %p261_p3 = scmp.ne.s32.totalorder %s28_s13, %s260_s23  ;;  %p266_p5 = scmp.lt.s32.totalorder %s260_s23, %s260_s23 }
   0xd   :  { %p267_p6 = por %p266_p5, %p265_p4 }
   0xf   :  { %p268_p7 = pnand %p267_p6, %p261_p3 }
  0x11   :  { %271 = shalt.err (!%p268_p7)
}
  0x12   :  { %30 = dma.hbm_to_vmem [thread:$0]  %s437_s1, 512, %s28_s13, [#allocation6]  }
  0x13   :  { %s272_s28 = scalar_lea.hbm %s436_s0, 512 }
  0x14   :  { %p273_p8 = scmp.ne.s32.totalorder %s436_s0, %s272_s28  ;;  %p276_p9 = scmp.lt.u32.totalorder %s272_s28, %s436_s0 }
  0x16   :  { %p278_p10 = pnand %p276_p9, %p273_p8 }
  0x18   :  { %281 = shalt.err (!%p278_p10)
}
  0x19   :  { %s282_s6 = scalar_lea.vmem %s18_s15, 512  ;;  %p287_p12 = scmp.lt.s32.totalorder %s18_s15, %s18_s15 }
  0x1a   :  { %p283_p11 = scmp.ne.s32.totalorder %s18_s15, %s282_s6  ;;  %p288_p13 = scmp.lt.s32.totalorder %s282_s6, %s282_s6 }
  0x1c   :  { %p289_p0 = por %p288_p13, %p287_p12 }
  0x1e   :  { %p290_p1 = pnand %p289_p0, %p283_p11 }
  0x20   :  { %293 = shalt.err (!%p290_p1)
}
  0x21   :  { %20 = dma.hbm_to_vmem [thread:$0]  %s436_s0, 512, %s18_s15, [#allocation3]  }
  0x22   :  { %s346_s8 = smov [#allocation7]   ;;  %s294_s12 = scalar_lea.hbm %s438_s2, 512 }
  0x23   :  { %s37_s9 = sshll.u32 %s346_s8, 4  ;;  %p295_p2 = scmp.ne.s32.totalorder %s438_s2, %s294_s12  ;;  %s38_s9 = int_to_ptr.vmem [resolvable:$true] %s37_s9 }
  0x24   :  { %p298_p3 = scmp.lt.u32.totalorder %s294_s12, %s438_s2 }
  0x26   :  { %p300_p4 = pnand %p298_p3, %p295_p2 }
  0x28   :  { %303 = shalt.err (!%p300_p4)
}
  0x29   :  { %s304_s18 = scalar_lea.vmem %s38_s9, 512  ;;  %p309_p6 = scmp.lt.s32.totalorder %s38_s9, %s38_s9 }
  0x2a   :  { %p305_p5 = scmp.ne.s32.totalorder %s38_s9, %s304_s18  ;;  %p310_p7 = scmp.lt.s32.totalorder %s304_s18, %s304_s18 }
  0x2c   :  { %p311_p8 = por %p310_p7, %p309_p6 }
  0x2e   :  { %p312_p9 = pnand %p311_p8, %p305_p5 }
  0x30   :  { %315 = shalt.err (!%p312_p9)
}
  0x31   :  { %40 = dma.hbm_to_vmem [thread:$0]  %s438_s2, 512, %s38_s9, [#allocation6]  }
  0x32   :  { %338 = dma.done.wait [#allocation3], 512  }
  0x33   :  { %339 = vsyncadd [#allocation3], 4294966784 }
  0x34   :  { %340 = dma.done.wait [#allocation6], 1024  }
  0x35   :  { %341 = vsyncadd [#allocation6], 4294966272  ;;  %v50_v0 = vld [vmem:[#allocation2] sm:$0xff]  ;;  %v51_v3 = vld [vmem:[#allocation2 + $0x8] sm:$0xff]  ;;  %s347_s2 = smov [#allocation8]  }
  0x36   :  { %v54_v1 = vld [vmem:[#allocation5] sm:$0xff]  ;;  %v55_v4 = vld [vmem:[#allocation5 + $0x8] sm:$0xff]  ;;  %v52_v6 = vld [vmem:[#allocation2 + $0x10] sm:$0xff]  ;;  %s204_s19 = sshll.u32 %s347_s2, 4  ;;  %s205_s19 = int_to_ptr.vmem [resolvable:$true] %s204_s19 }
  0x37   :  { %v404_v2 = vsub.f32 %v54_v1, %v50_v0  ;;  %v406_v5 = vsub.f32 %v55_v4, %v51_v3  ;;  %v56_v7 = vld [vmem:[#allocation5 + $0x10] sm:$0xff]  ;;  %v53_v10 = vld [vmem:[#allocation2 + $0x18] sm:$0xff]  ;;  %s316_s20 = scalar_lea.vmem %s205_s19, 512  ;;  %p321_p11 = scmp.lt.s32.totalorder %s205_s19, %s205_s19 }
  0x38   :  { %v409_v9 = vsub.f32 %v56_v7, %v52_v6  ;;  %v57_v11 = vld [vmem:[#allocation5 + $0x18] sm:$0xff]  ;;  %p317_p10 = scmp.ne.s32.totalorder %s205_s19, %s316_s20  ;;  %p322_p12 = scmp.lt.s32.totalorder %s316_s20, %s316_s20 }
  0x39   :  { %v66_v8 = vand.u32 2147483647, %v404_v2  ;;  %v67_v12 = vand.u32 2147483647, %v406_v5  ;;  %v413_v16 = vsub.f32 %v57_v11, %v53_v10  ;;  %v126_v37 = vsub.f32 0.0, %v404_v2 }
  0x3a   :  { %v68_v14 = vand.u32 2147483647, %v409_v9  ;;  %v127_v40 = vsub.f32 0.0, %v406_v5  ;;  %v118_v44 = vmin.f32 %v404_v2, 0.0  ;;  %v119_v45 = vmin.f32 %v406_v5, 0.0  ;;  %p323_p13 = por %p322_p12, %p321_p11 }
  0x3b   :  { %v70_v13 = vsub.f32 0.0, %v66_v8  ;;  %v71_v15 = vsub.f32 0.0, %v67_v12  ;;  %v69_v20 = vand.u32 2147483647, %v413_v16  ;;  %v130_v48 = vmin.f32 %v126_v37, 0.0 }
  0x3c   :  { %v72_v18 = vsub.f32 0.0, %v68_v14  ;;  %v128_v50 = vsub.f32 0.0, %v409_v9  ;;  %v131_v53 = vmin.f32 %v127_v40, 0.0  ;;  %v120_v57 = vmin.f32 %v409_v9, 0.0  ;;  %p324_p0 = pnand %p323_p13, %p317_p10 }
  0x3d   :  { %v74_v17 = vmul.f32 1.442695, %v70_v13  ;;  %v76_v19 = vmul.f32 1.442695, %v71_v15  ;;  %v73_v22 = vsub.f32 0.0, %v69_v20  ;;  %v129_v58 = vsub.f32 0.0, %v413_v16 }
  0x3e   :  { %v78_v21 = vmul.f32 1.442695, %v72_v18  ;;  %v132_v2 = vmin.f32 %v128_v50, 0.0  ;;  %v121_v10 = vmin.f32 %v413_v16, 0.0  ;;  %v59_v16 = vld [vmem:[#allocation7 + $0x8] sm:$0xff] }
  0x3f   :  { %218 = vpow2.f32 %v74_v17  ;;  %v80_v23 = vmul.f32 1.442695, %v73_v22  ;;  %v133_v11 = vmin.f32 %v129_v58, 0.0 }
  0x40   :  { %220 = vpow2.f32 %v76_v19 }
  0x41   :  { %222 = vpow2.f32 %v78_v21  ;;  %v58_v21 = vld [vmem:[#allocation7] sm:$0xff] }
  0x42   :  { %224 = vpow2.f32 %v80_v23 }
  0x49   :  { %v219_v24 = vpop.eup %218 }
  0x4a   :  { %v221_v25 = vpop.eup %220  ;;  %v82_v26 = vadd.f32 1.0, %v219_v24  ;;  %v85_v30 = vmul.f32 -0.5, %v219_v24  ;;  %v88_v36 = vand.u32 2147483647, %v219_v24 }
  0x4b   :  { %v223_v27 = vpop.eup %222  ;;  %v91_v28 = vadd.f32 1.0, %v221_v25  ;;  %v94_v32 = vmul.f32 -0.5, %v221_v25  ;;  %v97_v39 = vand.u32 2147483647, %v221_v25 }
  0x4c   :  { %226 = vlog2.f32 %v82_v26  ;;  %v100_v29 = vadd.f32 1.0, %v223_v27  ;;  %v225_v31 = vpop.eup %224  ;;  %v103_v33 = vmul.f32 -0.5, %v223_v27  ;;  %v86_v35 = vadd.f32 1.0, %v85_v30 }
  0x4d   :  { %228 = vlog2.f32 %v91_v28  ;;  %v109_v34 = vadd.f32 1.0, %v225_v31  ;;  %v95_v38 = vadd.f32 1.0, %v94_v32  ;;  %v106_v42 = vand.u32 2147483647, %v223_v27 }
  0x4e   :  { %230 = vlog2.f32 %v100_v29  ;;  %v104_v41 = vadd.f32 1.0, %v103_v33  ;;  %v87_v43 = vmul.f32 %v219_v24, %v86_v35  ;;  %v112_v46 = vmul.f32 -0.5, %v225_v31 }
  0x4f   :  { %232 = vlog2.f32 %v109_v34  ;;  %vm89_vm0 = vcmp.lt.f32.partialorder %v88_v36, 0.0004427343  ;;  %v96_v49 = vmul.f32 %v221_v25, %v95_v38  ;;  %vm98_vm1 = vcmp.lt.f32.partialorder %v97_v39, 0.0004427343  ;;  %v61_v34 = vld [vmem:[#allocation7 + $0x18] sm:$0xff] }
  0x50   :  { %v105_v54 = vmul.f32 %v223_v27, %v104_v41  ;;  %vm107_vm2 = vcmp.lt.f32.partialorder %v106_v42, 0.0004427343  ;;  %v113_v61 = vadd.f32 1.0, %v112_v46  ;;  %v115_v62 = vand.u32 2147483647, %v225_v31  ;;  %v60_v27 = vld [vmem:[#allocation7 + $0x10] sm:$0xff] }
  0x51   :  { %v178_v26 = vsub.f32 1.0, %v58_v21  ;;  %v179_v28 = vsub.f32 1.0, %v59_v16  ;;  %v180_v33 = vsub.f32 1.0, %v60_v27  ;;  %v181_v46 = vsub.f32 1.0, %v61_v34 }
  0x52   :  { %v114_v13 = vmul.f32 %v225_v31, %v113_v61  ;;  %vm116_vm3 = vcmp.lt.f32.partialorder %v115_v62, 0.0004427343 }
  0x56   :  { %v227_v47 = vpop.eup %226 }
  0x57   :  { %v229_v51 = vpop.eup %228  ;;  %v84_v52 = vmul.f32 0.6931472, %v227_v47 }
  0x58   :  { %v231_v55 = vpop.eup %230  ;;  %v93_v56 = vmul.f32 0.6931472, %v229_v51 }
  0x59   :  { %v90_v59 = vsel %vm89_vm0, %v87_v43, %v84_v52  ;;  %v102_v60 = vmul.f32 0.6931472, %v231_v55  ;;  %v233_v3 = vpop.eup %232 }
  0x5a   :  { %v122_v63 = vsub.f32 %v118_v44, %v90_v59  ;;  %v134_v0 = vsub.f32 %v130_v48, %v90_v59  ;;  %v99_v1 = vsel %vm98_vm1, %v96_v49, %v93_v56  ;;  %v111_v17 = vmul.f32 0.6931472, %v233_v3 }
  0x5b   :  { %v123_v4 = vsub.f32 %v119_v45, %v99_v1  ;;  %v135_v5 = vsub.f32 %v131_v53, %v99_v1  ;;  %v108_v6 = vsel %vm107_vm2, %v105_v54, %v102_v60 }
  0x5c   :  { %v138_v7 = vmul.f32 1.442695, %v122_v63  ;;  %v146_v8 = vmul.f32 1.442695, %v134_v0  ;;  %v124_v14 = vsub.f32 %v120_v57, %v108_v6  ;;  %v136_v15 = vsub.f32 %v132_v2, %v108_v6 }
  0x5d   :  { %v140_v9 = vmul.f32 1.442695, %v123_v4  ;;  %v148_v12 = vmul.f32 1.442695, %v135_v5  ;;  %v117_v20 = vsel %vm116_vm3, %v114_v13, %v111_v17  ;;  %v182_v32 = vmul.f32 %v178_v26, %v134_v0 }
  0x5e   :  { %234 = vpow2.f32 %v138_v7  ;;  %v142_v18 = vmul.f32 1.442695, %v124_v14  ;;  %v150_v19 = vmul.f32 1.442695, %v136_v15  ;;  %v125_v22 = vsub.f32 %v121_v10, %v117_v20 }
  0x5f   :  { %236 = vpow2.f32 %v146_v8  ;;  %v137_v23 = vsub.f32 %v133_v11, %v117_v20  ;;  %v162_v37 = vmul.f32 %v122_v63, %v58_v21  ;;  %v183_v41 = vmul.f32 %v179_v28, %v135_v5 }
  0x60   :  { %238 = vpow2.f32 %v140_v9  ;;  %v144_v24 = vmul.f32 1.442695, %v125_v22  ;;  %v163_v45 = vmul.f32 %v123_v4, %v59_v16  ;;  %v184_v51 = vmul.f32 %v180_v33, %v136_v15 }
  0x61   :  { %240 = vpow2.f32 %v148_v12  ;;  %v152_v25 = vmul.f32 1.442695, %v137_v23  ;;  %v164_v55 = vmul.f32 %v124_v14, %v60_v27  ;;  %v185_v1 = vmul.f32 %v181_v46, %v137_v23 }
  0x62   :  { %242 = vpow2.f32 %v142_v18  ;;  %v165_v5 = vmul.f32 %v125_v22, %v61_v34 }
  0x63   :  { %244 = vpow2.f32 %v150_v19 }
  0x64   :  { %246 = vpow2.f32 %v144_v24 }
  0x65   :  { %248 = vpow2.f32 %v152_v25 }
  0x68   :  { %v235_v29 = vpop.eup %234 }
  0x69   :  { %v237_v30 = vpop.eup %236  ;;  %v170_v31 = vmul.f32 %v235_v29, %v235_v29 }
  0x6a   :  { %v239_v35 = vpop.eup %238  ;;  %v154_v36 = vmul.f32 %v237_v30, %v237_v30 }
  0x6b   :  { %v241_v38 = vpop.eup %240  ;;  %v174_v39 = vmul.f32 0.75, %v170_v31  ;;  %v171_v40 = vmul.f32 %v239_v35, %v239_v35 }
  0x6c   :  { %v243_v42 = vpop.eup %242  ;;  %v158_v43 = vmul.f32 -0.25, %v154_v36  ;;  %v155_v44 = vmul.f32 %v241_v38, %v241_v38 }
  0x6d   :  { %v245_v47 = vpop.eup %244  ;;  %v186_v48 = vmul.f32 %v182_v32, %v174_v39  ;;  %v175_v49 = vmul.f32 0.75, %v171_v40  ;;  %v172_v50 = vmul.f32 %v243_v42, %v243_v42 }
  0x6e   :  { %v166_v52 = vmul.f32 %v162_v37, %v158_v43  ;;  %v159_v53 = vmul.f32 -0.25, %v155_v44  ;;  %v156_v54 = vmul.f32 %v245_v47, %v245_v47  ;;  %v247_v58 = vpop.eup %246 }
  0x6f   :  { %v187_v56 = vmul.f32 %v183_v41, %v175_v49  ;;  %v176_v57 = vmul.f32 0.75, %v172_v50  ;;  %v249_v62 = vpop.eup %248  ;;  %v173_v0 = vmul.f32 %v247_v58, %v247_v58 }
  0x70   :  { %v190_v59 = vsub.f32 %v166_v52, %v186_v48  ;;  %v167_v60 = vmul.f32 %v163_v45, %v159_v53  ;;  %v160_v61 = vmul.f32 -0.25, %v156_v54  ;;  %v157_v4 = vmul.f32 %v249_v62, %v249_v62 }
  0x71   :  { %v188_v63 = vmul.f32 %v184_v51, %v176_v57  ;;  %v177_v6 = vmul.f32 0.75, %v173_v0 }
  0x72   :  { %194 = vst [vmem:[#allocation8] sm:$0xff] %v190_v59  ;;  %v191_v2 = vsub.f32 %v167_v60, %v187_v56  ;;  %v168_v3 = vmul.f32 %v164_v55, %v160_v61  ;;  %v161_v8 = vmul.f32 -0.25, %v157_v4 }
  0x73   :  { %v189_v10 = vmul.f32 %v185_v1, %v177_v6 }
  0x74   :  { %195 = vst [vmem:[#allocation8 + $0x8] sm:$0xff] %v191_v2  ;;  %v192_v7 = vsub.f32 %v168_v3, %v188_v63  ;;  %v169_v11 = vmul.f32 %v165_v5, %v161_v8 }
  0x76   :  { %196 = vst [vmem:[#allocation8 + $0x10] sm:$0xff] %v192_v7  ;;  %v193_v9 = vsub.f32 %v169_v11, %v189_v10 }
  0x78   :  { %197 = vst [vmem:[#allocation8 + $0x18] sm:$0xff] %v193_v9 }
  0x79   :  { %327 = shalt.err (!%p324_p0)
}
  0x7a   :  { %s328_s23 = scalar_lea.hbm %s439_s3, 512 }
  0x7b   :  { %p329_p1 = scmp.ne.s32.totalorder %s439_s3, %s328_s23  ;;  %p332_p2 = scmp.lt.u32.totalorder %s328_s23, %s439_s3 }
  0x7d   :  { %p334_p3 = pnand %p332_p2, %p329_p1 }
  0x7f   :  { %337 = shalt.err (!%p334_p3)
}
  0x80   :  { %207 = dma.vmem_to_hbm [thread:$0]  %s205_s19, 512, %s439_s3, [#allocation4]  }
  0x81   :  { %342 = dma.done.wait [#allocation4], 512  }
  0x82   :  { %343 = vsyncadd [#allocation4], 4294966784 }
  0x83   :  { %211 = vsyncpa [#allocation3], 1 }
  0x84   :  { %212 = vsyncpa [#allocation6], 1 }
  0x85   :  { %213 = vsyncpa [#allocation4], 1 }

</bundles_post_ra>
